<compile_context>
chip_gen: v5e
topology: v5e:2x2
jax: 0.10.0
libtpu: 0.0.40
codegen_flags: <defaults>
</compile_context>

<pallas_src>
import functools

import jax
import jax.numpy as jnp
from jax.experimental import pallas as pl
from jax.experimental.pallas import tpu as pltpu


# ---------------------------------------------------------------------------
# VMEM budgeting (generation-aware)
# ---------------------------------------------------------------------------

def _vmem_caps():
    """Return (physical_vmem_bytes, usable_scoped_limit_bytes) for this chip."""
    cap = 64 << 20                      # conservative fallback (v7x per-TC VMEM)
    try:
        info = pltpu.get_tpu_info()
        cap = int(getattr(info, "vmem_capacity_bytes", cap)) or cap
    except Exception:
        pass
    cap = max(cap, 64 << 20)            # all supported gens have >= 64 MiB / TC
    # Headroom for compiler-internal scratch, semaphores and pipeline state:
    # ~96 MiB usable on 128 MiB parts (v5e/v6e), ~48 MiB on 64 MiB parts (v7x).
    usable = max(32 << 20, min(cap * 3 // 4, cap - (16 << 20)))
    return cap, usable


def _clamp_vmem(nbytes, usable):
    return int(min(usable, max(32 << 20, nbytes)))


def _sublane(itemsize):
    """Sublane packing granularity for a dtype (8 f32 / 16 bf16 / 32 int8)."""
    return max(8, 32 // max(1, itemsize))


def _pick_c_tile(C, HW, itemsize, budget_bytes, n_bufs, count_f32_temp,
                 max_tile=None):
    """Largest channel tile (multiple of the sublane pack dividing C, or full
    C) whose live VMEM footprint fits `budget_bytes`."""
    sub = _sublane(itemsize)
    per_chan = n_bufs * HW * itemsize + (HW * 4 if count_f32_temp else 0)
    cands = [C]
    d = sub
    while d < C:
        if C % d == 0:
            cands.append(d)
        d += sub
    if max_tile is not None:
        capped = [c for c in cands if c <= max_tile]
        cands = capped or [min(cands)]
    fitting = [c for c in cands if c * per_chan <= budget_bytes]
    if fitting:
        return max(fitting)
    # TODO(synk): for extreme H*W where even the minimum C tile exceeds the
    # budget, an additional masked HW grid axis would be needed; fall back to
    # the smallest valid tile (compiler may spill).
    return min(cands)


# ---------------------------------------------------------------------------
# In-kernel helpers
# ---------------------------------------------------------------------------

def _shift_channels(y, s):
    """z[:, c] = y[:, c + s] with zero fill outside [0, C).  `s` is static."""
    n, c = y.shape
    if s == 0:
        return y
    if abs(s) >= c:
        return jnp.zeros_like(y)
    z = jnp.zeros((n, abs(s)), y.dtype)
    if s > 0:
        return jnp.concatenate([y[:, s:], z], axis=-1)
    return jnp.concatenate([z, y[:, : c + s]], axis=-1)


def _conv_sigmoid(y, w_ref, k):
    """k-tap 'same' conv over channels (taps in SMEM), then sigmoid.

    y: (1, C) f32 pooled means.  Matches nn.Conv1d(1, 1, k, pad=(k-1)//2,
    bias=False) applied along the channel axis (odd k).
    """
    pad = (k - 1) // 2
    acc = jnp.zeros_like(y)
    for j in range(k):                      # static unroll: k VPU FMAs
        acc = acc + w_ref[j] * _shift_channels(y, j - pad)
    return jax.nn.sigmoid(acc)


# ---------------------------------------------------------------------------
# Kernels
# ---------------------------------------------------------------------------

def _eca_fused_kernel(w_ref, x_ref, o_ref, *, k, inv_hw):
    """One batch image per grid step: pool + conv + sigmoid + scale."""
    x = x_ref[...]                                            # (1, C, HW)
    y = jnp.sum(x.astype(jnp.float32), axis=-1) * inv_hw      # (1, C) f32
    scale = _conv_sigmoid(y, w_ref, k).astype(x.dtype)        # (1, C)
    o_ref[...] = x * scale[:, :, None]


def _eca_pool_kernel(x_ref, s_ref, *, inv_hw):
    """Pass 1 (two-pass path): spatial mean of a contiguous C-tile block."""
    x = x_ref[...]                                            # (1, Ct, HW)
    s = jnp.sum(x.astype(jnp.float32), axis=-1) * inv_hw      # (1, Ct)
    s_ref[...] = s[:, :, None]                                # (1, Ct, 1)


def _eca_scale_kernel(g_ref, x_ref, o_ref):
    """Pass 2 (two-pass path): elementwise scale of a contiguous C-tile block."""
    o_ref[...] = x_ref[...] * g_ref[...].astype(x_ref.dtype)


# ---------------------------------------------------------------------------
# Plain-JAX glue for the two-pass path (tiny: B*C*k FLOPs)
# ---------------------------------------------------------------------------

def _conv_sigmoid_dense(means, w):
    """means: (B, C) f32 pooled means -> sigmoid(k-tap 'same' conv)."""
    k = w.shape[0]
    pad = (k - 1) // 2
    C = means.shape[1]
    yp = jnp.pad(means, ((0, 0), (pad, pad)))
    acc = jnp.zeros_like(means)
    for j in range(k):
        acc = acc + w[j] * yp[:, j:j + C]
    return jax.nn.sigmoid(acc)


# ---------------------------------------------------------------------------
# Wrapper
# ---------------------------------------------------------------------------

def eca_forward(x, w, *, force_two_pass=False, c_tile=None, donate_x=False):
    """ECA forward.  x: (B, C, H, W), w: (k,) conv taps (odd k).

    donate_x: alias the output onto x's HBM buffer (only if x is dead after).
    """
    B, C, H, W = x.shape
    HW = H * W
    k = int(w.shape[0])
    assert k % 2 == 1, "ECA conv kernel size must be odd (pad=(k-1)//2)"
    itemsize = jnp.dtype(x.dtype).itemsize
    xr = x.reshape(B, C, HW)
    w = w.astype(jnp.float32)

    cap, usable = _vmem_caps()
    likely_two_tc = cap <= (96 << 20)            # v7x: 64 MiB per TensorCore
    sub = _sublane(itemsize)
    x_bytes = B * C * HW * itemsize

    # Fused-path live VMEM: 2x in + 2x out (double buffered) + f32 upcast temp
    # for sub-4-byte inputs.
    block_bytes = C * HW * itemsize
    f32_temp = 0 if itemsize >= 4 else C * HW * 4
    fused_live = 4 * block_bytes + f32_temp
    fused_ok = (not force_two_pass) and (fused_live + (4 << 20) <= usable)

    max_c_tile = None
    if (fused_ok and likely_two_tc and B == 1 and c_tile is None
            and C % (2 * sub) == 0 and x_bytes >= (2 << 20)):
        # v7x with batch 1: the fused (B,)-parallel grid idles one TensorCore;
        # the C-tiled two-pass grids (B, n_c >= 2) feed both.
        fused_ok = False
        max_c_tile = C // 2

    if fused_ok:
        # One pass: read x once, write once (optimal HBM traffic, 2x bytes).
        vlim = _clamp_vmem(fused_live + (4 << 20), usable)
        out = pl.pallas_call(
            functools.partial(_eca_fused_kernel, k=k, inv_hw=1.0 / HW),
            out_shape=jax.ShapeDtypeStruct((B, C, HW), x.dtype),
            grid_spec=pltpu.PrefetchScalarGridSpec(
                num_scalar_prefetch=1,                 # conv taps -> SMEM
                grid=(B,),
                in_specs=[pl.BlockSpec((1, C, HW), lambda b, w_s: (b, 0, 0))],
                out_specs=pl.BlockSpec((1, C, HW), lambda b, w_s: (b, 0, 0)),
            ),
            compiler_params=pltpu.CompilerParams(
                dimension_semantics=("parallel",),
                vmem_limit_bytes=vlim),
            cost_estimate=pl.CostEstimate(
                flops=2 * B * C * HW + 2 * B * C * k,
                transcendentals=B * C,
                bytes_accessed=2 * B * C * HW * itemsize),
            input_output_aliases=({1: 0} if donate_x else {}),
        )(w, xr)
        return out.reshape(B, C, H, W)

    # ---------------- Two-pass path: C-tiled, contiguous HBM blocks ---------
    budget = usable - (4 << 20)
    if c_tile is not None:
        assert c_tile == C or (C % c_tile == 0 and c_tile % sub == 0), (
            "c_tile must divide C and be a multiple of the sublane pack")
        ct1 = ct2 = int(c_tile)
    else:
        # Pass 1 only double-buffers its input (output gate is tiny), so its
        # tile can be roughly 2x the pass-2 tile.
        ct1 = _pick_c_tile(C, HW, itemsize, budget, n_bufs=2,
                           count_f32_temp=(itemsize < 4), max_tile=max_c_tile)
        ct2 = _pick_c_tile(C, HW, itemsize, budget, n_bufs=4,
                           count_f32_temp=False, max_tile=max_c_tile)
    n_c1 = C // ct1
    n_c2 = C // ct2

    vlim1 = _clamp_vmem(
        ct1 * (2 * HW * itemsize + (HW * 4 if itemsize < 4 else 0)) + (4 << 20),
        usable)
    vlim2 = _clamp_vmem(4 * ct2 * HW * itemsize + (4 << 20), usable)

    # Pass 1: per-(batch, channel) spatial means (B, C, 1), both axes parallel.
    pooled = pl.pallas_call(
        functools.partial(_eca_pool_kernel, inv_hw=1.0 / HW),
        out_shape=jax.ShapeDtypeStruct((B, C, 1), jnp.float32),
        grid_spec=pltpu.PrefetchScalarGridSpec(
            num_scalar_prefetch=0,
            grid=(B, n_c1),
            in_specs=[pl.BlockSpec((1, ct1, HW), lambda b, ci: (b, ci, 0))],
            out_specs=pl.BlockSpec((1, ct1, 1), lambda b, ci: (b, ci, 0)),
        ),
        compiler_params=pltpu.CompilerParams(
            dimension_semantics=("parallel", "parallel"),
            vmem_limit_bytes=vlim1),
        cost_estimate=pl.CostEstimate(
            flops=B * C * HW,
            transcendentals=0,
            bytes_accessed=B * C * HW * itemsize + B * C * 4),
    )(xr)

    # Tiny k-tap conv + sigmoid over (B, C) means: plain-JAX epilogue
    # (coupling neighbouring channels across C tiles in-kernel would need
    # halos for a negligible amount of work).
    gate = _conv_sigmoid_dense(pooled[..., 0], w)[:, :, None]   # (B, C, 1) f32

    # Pass 2: broadcast-scale x by the gate; both grid axes parallel.
    out = pl.pallas_call(
        _eca_scale_kernel,
        out_shape=jax.ShapeDtypeStruct((B, C, HW), x.dtype),
        grid_spec=pltpu.PrefetchScalarGridSpec(
            num_scalar_prefetch=0,
            grid=(B, n_c2),
            in_specs=[
                pl.BlockSpec((1, ct2, 1), lambda b, ci: (b, ci, 0)),
                pl.BlockSpec((1, ct2, HW), lambda b, ci: (b, ci, 0)),
            ],
            out_specs=pl.BlockSpec((1, ct2, HW), lambda b, ci: (b, ci, 0)),
        ),
        compiler_params=pltpu.CompilerParams(
            dimension_semantics=("parallel", "parallel"),
            vmem_limit_bytes=vlim2),
        cost_estimate=pl.CostEstimate(
            flops=B * C * HW,
            transcendentals=0,
            bytes_accessed=2 * B * C * HW * itemsize + B * C * 4),
        input_output_aliases=({1: 0} if donate_x else {}),
    )(gate, xr)
    return out.reshape(B, C, H, W)


# ---------------------------------------------------------------------------
# Pure-JAX reference (matches the PyTorch module)
# ---------------------------------------------------------------------------

def _eca_ref(x, w):
    B, C, H, W = x.shape
    k = w.shape[0]
    pad = (k - 1) // 2
    y = x.mean(axis=(2, 3))                               # (B, C)
    yp = jnp.pad(y, ((0, 0), (pad, pad)))                 # zero-padded channels
    conv = jnp.stack(
        [jnp.sum(yp[:, c:c + k] * w, axis=-1) for c in range(C)], axis=-1)
    s = jax.nn.sigmoid(conv)                              # (B, C)
    return x * s[:, :, None, None]


if __name__ == "__main__":
    key = jax.random.PRNGKey(0)
    k1, k2, k3, k4, k5 = jax.random.split(key, 5)

    # Config 1: default dispatch (fused one-pass path).
    B, C, H, W, ks = 2, 4, 16, 16, 3
    x = jax.random.normal(k1, (B, C, H, W), dtype=jnp.float32)
    bound = 1.0 / (ks ** 0.5)
    w = jax.random.uniform(k2, (ks,), minval=-bound, maxval=bound,
                           dtype=jnp.float32)
    out = jax.block_until_ready(eca_forward(x, w))
    ref = _eca_ref(x, w)
    assert out.shape == (B, C, H, W)
    assert jnp.allclose(out, ref, atol=1e-5, rtol=1e-5), "fused path mismatch"

    # Config 2: forced two-pass C-tiled path (C=16, c_tile=8) with HW=144
    # (not a multiple of 128 -- no special handling needed with C tiling).
    x2 = jax.random.normal(k3, (2, 16, 12, 12), dtype=jnp.float32)
    out2 = jax.block_until_ready(
        eca_forward(x2, w, force_two_pass=True, c_tile=8))
    assert jnp.allclose(out2, _eca_ref(x2, w), atol=1e-5, rtol=1e-5), \
        "two-pass mismatch"

    # Config 3: k=5 taps and odd spatial size (5x5), fused path.
    b5 = 1.0 / (5 ** 0.5)
    w5 = jax.random.uniform(k4, (5,), minval=-b5, maxval=b5, dtype=jnp.float32)
    x3 = jax.random.normal(k5, (2, 8, 5, 5), dtype=jnp.float32)
    out3 = jax.block_until_ready(eca_forward(x3, w5))
    assert jnp.allclose(out3, _eca_ref(x3, w5), atol=1e-5, rtol=1e-5), \
        "k=5 / odd-HW mismatch"

    # Config 4: bf16 input (f32 pooling accumulation inside the kernel).
    xb = jax.random.normal(k1, (2, 16, 16, 16), dtype=jnp.bfloat16)
    outb = jax.block_until_ready(eca_forward(xb, w))
    refb = _eca_ref(xb.astype(jnp.float32), w)
    assert outb.dtype == jnp.bfloat16
    assert jnp.allclose(outb.astype(jnp.float32), refb, atol=5e-2, rtol=5e-2), \
        "bf16 mismatch"

    # Config 5: output aliased onto a dead input buffer (donate_x).
    xd = jax.random.normal(k3, (2, 4, 16, 16), dtype=jnp.float32)
    refd = _eca_ref(xd, w)
    outd = jax.block_until_ready(eca_forward(xd, w, donate_x=True))
    assert jnp.allclose(outd, refd, atol=1e-5, rtol=1e-5), "donate_x mismatch"

    print("KERNEL_OK")
</pallas_src>

<mosaic_0001>
module attributes {stable_mosaic.version = 11 : i64} {
  func.func @_eca_fused_kernel(%arg0: i32, %arg1: memref<3xf32, #tpu.memory_space<smem>>, %arg2: memref<1x4x256xf32, #tpu.memory_space<vmem>>, %arg3: memref<1x4x256xf32, #tpu.memory_space<vmem>>) attributes {dimension_semantics = [#tpu.dimension_semantics<parallel>], iteration_bounds = array<i64: 2>, scalar_prefetch = 1 : i64, scratch_operands = 0 : i64, tpu.core_type = #tpu.core_type<tc>, window_params = [{transform_indices = @transform_0, window_bounds = array<i64: 1, 4, 256>}, {transform_indices = @transform_1, window_bounds = array<i64: 1, 4, 256>}]} {
    %c0 = arith.constant 0 : index
    %c0_0 = arith.constant 0 : index
    %c0_1 = arith.constant 0 : index
    %0 = vector.load %arg2[%c0, %c0_0, %c0_1] : memref<1x4x256xf32, #tpu.memory_space<vmem>>, vector<1x4x256xf32>
    %cst = arith.constant dense<0.000000e+00> : vector<1x4xf32>
    %1 = vector.multi_reduction <add>, %0, %cst [2] : vector<1x4x256xf32> to vector<1x4xf32>
    %cst_2 = arith.constant 3.906250e-03 : f32
    %2 = vector.broadcast %cst_2 : f32 to vector<1x4xf32>
    %3 = arith.mulf %1, %2 : vector<1x4xf32>
    %cst_3 = arith.constant 0.000000e+00 : f32
    %4 = vector.broadcast %cst_3 : f32 to vector<1x4xf32>
    %c0_4 = arith.constant 0 : index
    %5 = memref.load %arg1[%c0_4] : memref<3xf32, #tpu.memory_space<smem>>
    %cst_5 = arith.constant 0.000000e+00 : f32
    %6 = vector.broadcast %cst_5 : f32 to vector<1x1xf32>
    %7 = vector.extract_strided_slice %3 {offsets = [0, 0], sizes = [1, 3], strides = [1, 1]} : vector<1x4xf32> to vector<1x3xf32>
    %8 = tpu.concatenate %6, %7 in 1 : vector<1x1xf32>, vector<1x3xf32> -> vector<1x4xf32>
    %9 = vector.broadcast %5 : f32 to vector<1x4xf32>
    %10 = arith.mulf %9, %8 : vector<1x4xf32>
    %11 = arith.addf %4, %10 : vector<1x4xf32>
    %c1 = arith.constant 1 : index
    %12 = memref.load %arg1[%c1] : memref<3xf32, #tpu.memory_space<smem>>
    %13 = vector.broadcast %12 : f32 to vector<1x4xf32>
    %14 = arith.mulf %13, %3 : vector<1x4xf32>
    %15 = arith.addf %11, %14 : vector<1x4xf32>
    %c2 = arith.constant 2 : index
    %16 = memref.load %arg1[%c2] : memref<3xf32, #tpu.memory_space<smem>>
    %cst_6 = arith.constant 0.000000e+00 : f32
    %17 = vector.broadcast %cst_6 : f32 to vector<1x1xf32>
    %18 = vector.extract_strided_slice %3 {offsets = [0, 1], sizes = [1, 3], strides = [1, 1]} : vector<1x4xf32> to vector<1x3xf32>
    %19 = tpu.concatenate %18, %17 in 1 : vector<1x3xf32>, vector<1x1xf32> -> vector<1x4xf32>
    %20 = vector.broadcast %16 : f32 to vector<1x4xf32>
    %21 = arith.mulf %20, %19 : vector<1x4xf32>
    %22 = arith.addf %15, %21 : vector<1x4xf32>
    %23 = arith.negf %22 : vector<1x4xf32>
    %24 = math.exp %23 : vector<1x4xf32>
    %cst_7 = arith.constant 1.000000e+00 : f32
    %25 = vector.broadcast %cst_7 : f32 to vector<1x4xf32>
    %26 = arith.addf %25, %24 : vector<1x4xf32>
    %27 = arith.divf %25, %26 : vector<1x4xf32>
    %28 = vector.shape_cast %27 : vector<1x4xf32> to vector<1x4x1xf32>
    %29 = vector.broadcast %28 : vector<1x4x1xf32> to vector<1x4x256xf32>
    %30 = arith.mulf %0, %29 : vector<1x4x256xf32>
    %c0_8 = arith.constant 0 : index
    %c0_9 = arith.constant 0 : index
    %c0_10 = arith.constant 0 : index
    %31 = vector.load %arg3[%c0_8, %c0_9, %c0_10] : memref<1x4x256xf32, #tpu.memory_space<vmem>>, vector<1x4x256xf32>
    tpu.vector_store %arg3[%c0_8, %c0_9, %c0_10], %30 {strides = array<i32>} : memref<1x4x256xf32, #tpu.memory_space<vmem>>, vector<1x4x256xf32>,
    return
  }
  func.func @transform_0(%arg0: i32, %arg1: memref<3xf32, #tpu.memory_space<smem>>) -> (i32, i32, i32) {
    %c0_i32 = arith.constant 0 : i32
    %c0_i32_0 = arith.constant 0 : i32
    %c0_i32_1 = arith.constant 0 : i32
    return %arg0, %c0_i32, %c0_i32_0 : i32, i32, i32
  }
  func.func @transform_1(%arg0: i32, %arg1: memref<3xf32, #tpu.memory_space<smem>>) -> (i32, i32, i32) {
    %c0_i32 = arith.constant 0 : i32
    %c0_i32_0 = arith.constant 0 : i32
    %c0_i32_1 = arith.constant 0 : i32
    return %arg0, %c0_i32, %c0_i32_0 : i32, i32, i32
  }
}

</mosaic_0001>

<bundles_post_ra>
// kernel: tpu_custom_call.1
= control target key start
LH: loop header
LB: loop body
LE: loop exit
PB: predicated region body
PF: predicated region fallthrough
CT: control target
= control target key end

     0   :  { %s494_s12 = smov [#allocation3]   ;;  %s649_s0 = inlined_call_operand.hbm [shape: f32[3], index: 0, kind: input, shape index: {}]   ;;  %s650_s1 = inlined_call_operand.hbm [shape: f32[2,4,256], index: 1, kind: input, shape index: {}]   ;;  %s651_s2 = inlined_call_operand.hbm [shape: f32[2,4,256], index: 2, kind: output, shape index: {}]  }
   0x1   :  { %s8_s11 = sshll.u32 %s649_s0, 4  ;;  %s9_s11 = int_to_ptr.hbm [resolvable:$true] %s8_s11 }
   0x2   :  { %11 = dma.hbm_to_smem %s9_s11, 16, %s494_s12, [#allocation2] }
   0x3   :  { %468 = dma.done.wait [#allocation2], 16 }
   0x4   :  { %469 = vsyncadd [#allocation2], 4294967280 }
   0x5   :  { %14 = sfence }
   0x6   :  { %15 = vsyncpa [#allocation5], 0 }
   0x7   :  { %17 = vsyncpa [#allocation5 + $0x1], 0 }
   0x8   :  { %18 = vsyncpa [#allocation6], 0 }
   0x9   :  { %20 = vsyncpa [#allocation6 + $0x1], 0  ;;  %s514_s13 = smov 0   ;;  %s516_s14 = smov 0  }
   0xa   :  { %s518_s15 = smov 0   ;;  %s520_s16 = smov 0  }
   0xb LB: > { %s535_s0 = sadd.s32 4294967295, %s492_s16   ;;  %s310_s17 = sadd.s32 4294967294, %s492_s16   ;;  %s492_s16 = sphi %s520_s16, %s661_s16   ;;  %s488_s15 = sphi %s518_s15, %s660_s15   ;;  %s484_s14 = sphi %s516_s14, %s659_s14   ;;  %s480_s13 = sphi %s514_s13, %s658_s13  }
   0xc   : > { %s539_s18 = sadd.s32 1, %s492_s16   ;;  %s33_s19 = sadd.s32 1, %s488_s15 }
   0xd   : > { %s30_s20 = ssub.s32 %s492_s16, %s539_s18  ;;  %p40_p0 = scmp.ne.s32.totalorder %s488_s15, %s484_s14 }
   0xe   : > { %p31_p1 = scmp.eq.s32.totalorder %s30_s20, 0  ;;  %p41_p2 = scmp.eq.s32.totalorder %s492_s16, 0 }
   0xf   : > { %p46_p3 = scmp.ne.s32.totalorder %s484_s14, %s480_s13  ;;  %p47_p4 = scmp.eq.s32.totalorder %s535_s0, 0 }
  0x10   : > { %s551_s21 = scalar_select %p31_p1, %s488_s15, %s33_s19  }
  0x11   : > { %p553_p5 = por %p41_p2, %p40_p0  ;;  %p557_p6 = por %p47_p4, %p46_p3 }
  0x12   : > { %p70_p7 = scmp.eq.s32.totalorder %s535_s0, 1  ;;  %p76_p8 = scmp.eq.s32.totalorder %s310_s17, 1 }
  0x13   : > { %p341_p10 = scmp.lt.s32.totalorder %s492_s16, 2  ;;  %s96_s26 = sand.u32 1, %s488_s15  }
  0x14   : > { %p564_p11 = por %p70_p7, %p40_p0  ;;  %p568_p12 = por %p76_p8, %p46_p3 }
  0x15   : > { %s327_s27 = sshll.u32 %s492_s16, 3  ;;  %s313_s28 = sshll.u32 %s96_s26, 3 }
  0x16   : > { %s105_s3 = scalar_lea.hbm %s650_s1, %s327_s27  ;;  %s100_s5 = scalar_lea.vmem [#allocation4], %s313_s28 }
  0x17   : > { %s107_s4 = sshll.u32 %s105_s3, 4  ;;  %s109_s6 = sshll.u32 %s100_s5, 4  ;;  %s108_s4 = int_to_ptr.hbm [resolvable:$true] %s107_s4  ;;  %s110_s6 = int_to_ptr.vmem [resolvable:$true] %s109_s6 }
  0x18   : > { %p579_p13 = pnand %p341_p10, %p553_p5  ;;  %p316_p0 = scmp.ge.s32.totalorder %s492_s16, 1 }
  0x19   : > { %p114_p1 = scmp.lt.s32.totalorder %s492_s16, 3  ;;  %s97_s8 = scalar_lea.sflag [#allocation5], %s96_s26 }
  0x1a   : > { %s394_s9 = sshra.s32 %s108_s4, 4  ;;  %p398_p3 = pneg %p579_p13  ;;  %s395_s9 = int_to_ptr.hbm [resolvable:$true] %s394_s9 }
  0x1b   : > { %s396_s10 = scalar_lea.hbm %s395_s9, 8  ;;  %s401_s17 = scalar_lea.hbm %s650_s1, 16 }
  0x1c   : > { %p397_p2 = scmp.ne.s32.totalorder %s395_s9, %s396_s10  ;;  %p402_p5 = scmp.lt.s32.totalorder %s395_s9, %s650_s1 }
  0x1d   : > { %p403_p8 = scmp.lt.s32.totalorder %s401_s17, %s396_s10 }
  0x1e   : > { %p399_p4 = pnand %p398_p3, %p397_p2 }
  0x1f   : > { %p404_p10 = por %p403_p8, %p402_p5 }
  0x20   : > { %p400_p7 = pneg %p399_p4 }
  0x22   : > { %p405_p9 = pnand %p404_p10, %p400_p7 }
  0x24   : > { %408 = shalt.err (!%p405_p9)
}
  0x25   : > { %336 = dma.hbm_to_vmem [thread:$0]  (!%p579_p13), %s108_s4, 128, %s110_s6, %s97_s8  }
  0x26   : > { %p115_p2 = pnand %p316_p0, %p114_p1 }
  0x27   : > { %s600_s22 = sand.u32 (!%p115_p2), 1, %s484_s14  }
  0x28   : > { %118 = sbr.rel (%p115_p2) target bundleno = 337 (0x151), region = 24  ;;  %s317_s26 = sshll.u32 (!%p115_p2), %s600_s22, 3 }
  0x29   : > { %s121_s27 = scalar_lea.sflag (!%p115_p2), [#allocation5], %s600_s22  ;;  %s124_s28 = scalar_lea.vmem (!%p115_p2), [#allocation4], %s317_s26 }
  0x2d   : > { %471 = dma.done.wait (%p557_p6), %s121_s27, 128  }
  0x2e   : > { %473 = vsyncadd (%p557_p6), %s121_s27, 4294967168  ;;  %v610_v0 = vld [vmem:[%s124_s28] sm:$0xff]  ;;  %vm151_vm0 = vcmask 1043456   ;;  %v160_v6 = vlaneseq  ;;  %s319_s29 = sld [smem:[#allocation3 + $0x1]]  ;;  %vm165_vm1 = vcmask 7168   ;;  %vm181_vm2 = vcmask 23552  }
  0x2f   : > { %146 = vst [vmem:[#allocation1] ss:$2 sm:$0xff] %v610_v0  ;;  %s158_s30 = sld [smem:[#allocation3]]  ;;  %v495_v41 = vmov 839922192   ;;  %s328_s23 = sshll.u32 %s535_s0, 3 }
  0x30   : > { %v210_v7 = vshrl.u32 %v160_v6, 7  ;;  %v161_v8 = vand.u32 127, %v160_v6  ;;  %s320_s3 = sld [smem:[#allocation3 + $0x2]]  ;;  %v217_v42 = vunpack.c.l.s4 %v495_v41  ;;  %s235_s6 = scalar_lea.hbm %s651_s2, %s328_s23 }
  0x31   : > { %s143_s7 = scalar_lea.vmem [#allocation7], %s317_s26  ;;  %s239_s9 = sshll.u32 %s235_s6, 4  ;;  %s240_s9 = int_to_ptr.hbm [resolvable:$true] %s239_s9 }
  0x32   : > { %377 = vset.pattern.permute.xlu0 %v210_v7  ;;  %v162_v9 = vadd.s32 4294967295, %v161_v8  ;;  %v178_v10 = vadd.s32 1, %v161_v8  ;;  %v218_v43 = vunpack.c.0.s8 %v217_v42  ;;  %s237_s8 = sshll.u32 %s143_s7, 4  ;;  %s224_s10 = scalar_lea.sflag [#allocation6], %s600_s22  ;;  %s238_s8 = int_to_ptr.vmem [resolvable:$true] %s237_s8 }
  0x33   : > { %s438_s11 = sshra.s32 %s240_s9, 4  ;;  %s444_s19 = scalar_lea.hbm %s651_s2, 16  ;;  %s439_s11 = int_to_ptr.hbm [resolvable:$true] %s438_s11 }
  0x34   : > { %v171_v11 = vstv %s319_s29  ;;  %s440_s0 = scalar_lea.hbm %s439_s11, 8  ;;  %p445_p0 = scmp.lt.s32.totalorder %s439_s11, %s651_s2 }
  0x35   : > { %v167_v14 = vstv %s158_s30  ;;  %p441_p6 = scmp.ne.s32.totalorder %s439_s11, %s440_s0  ;;  %p446_p1 = scmp.lt.s32.totalorder %s444_s19, %s440_s0 }
  0x36   : > { %v147_v1 = vld.sshfl [vmem:[#allocation1] sm:$0xff pattern:$0x75316420]  ;;  %v148_v2 = vld.sshfl [vmem:[#allocation1 + $0x8] sm:$0xff pattern:$0x75316420]  ;;  %v183_v18 = vstv %s320_s3 }
  0x37   : > { %v152_v3 = vsel %vm151_vm0, %v147_v1, 0.0  ;;  %v153_v4 = vsel %vm151_vm0, %v148_v2, 0.0  ;;  %p442_p9 = pnand %p441_p6, %p564_p11  ;;  %p447_p3 = por %p446_p1, %p445_p0 }
  0x38   : > { %v154_v5 = vadd.f32 %v153_v4, %v152_v3 }
  0x39   : > { %p443_p13 = pneg %p442_p9 }
  0x3a   : > { %155 = vadd.xlane.f32.xlu0 %v154_v5 }
  0x3b   : > { %p448_p4 = pnand %p447_p3, %p443_p13 }
  0xad   : > { %v156_v12 = vpop.xlane.xlu0 %155 }
  0xae   : > { %v157_v13 = vmul.f32 0.00390625, %v156_v12 }
  0xb0   : > { %v172_v15 = vmul.f32 %v171_v11, %v157_v13  ;;  %v163_v16 = vperm.slane %v157_v13, %v162_v9  ;;  %v179_v17 = vperm.slane %v157_v13, %v178_v10 }
  0xb2   : > { %v166_v19 = vsel %vm165_vm1, 0.0, %v163_v16  ;;  %v174_v20 = vperm.slane %v172_v15, %v161_v8  ;;  %v182_v21 = vsel %vm181_vm2, %v179_v17, 0.0 }
  0xb3   : > { %v168_v22 = vmul.f32 %v167_v14, %v166_v19  ;;  %v184_v23 = vmul.f32 %v183_v18, %v182_v21 }
  0xb5   : > { %v176_v24 = vadd.f32 %v174_v20, %v168_v22  ;;  %v186_v25 = vrot.slane %v184_v23, 1 }
  0xb7   : > { %v188_v26 = vadd.f32 %v186_v25, %v176_v24 }
  0xb9   : > { %v321_v27 = vmul.f32 -1.442695, %v188_v26 }
  0xbb   : > { %378 = vpow2.f32 %v321_v27 }
  0xc1   : > { %v379_v28 = vpop.eup %378 }
  0xc2   : > { %v192_v29 = vadd.f32 1.0, %v379_v28 }
  0xc4   : > { %380 = vrcp.f32 %v192_v29  ;;  %v204_v33 = vand.u32 2147483648, %v192_v29  ;;  %v202_v35 = vand.u32 2147483647, %v192_v29  ;;  %vm198_vm4 = vweird.f32 %v192_v29 }
  0xc6   : > { %v205_v37 = vor.u32 1.1754944e-38, %v204_v33  ;;  %vm203_vm6 = vcmp.eq.f32.partialorder %v202_v35, 8.507059e+37 }
  0xca   : > { %v381_v30 = vpop.eup %380 }
  0xcb   : > { %v194_v31 = vmul.f32 %v381_v30, %v192_v29  ;;  %vm199_vm3 = vweird.f32 %v381_v30 }
  0xcc   : > { %vm200_vm5 = vmor %vm198_vm4, %vm199_vm3 }
  0xcd   : > { %v195_v32 = vsub.f32 1.0, %v194_v31 }
  0xcf   : > { %v196_v34 = vmul.f32 %v381_v30, %v195_v32 }
  0xd1   : > { %v197_v36 = vadd.f32 %v381_v30, %v196_v34 }
  0xd3   : > { %v201_v38 = vsel %vm200_vm5, %v381_v30, %v197_v36 }
  0xd4   : > { %v206_v39 = vsel %vm203_vm6, %v205_v37, %v201_v38 }
  0xd5   : > { %v208_v40 = vperm.slane %v206_v39, 0 }
  0xd7   : > { %213 = vperm.xlu0 %377, %v208_v40  }
 0x149   : > { %v214_v44 = vpop.permute.xlu0 %213 }
 0x14a   : > { %v219_v45 = vperm.slane %v214_v44, %v218_v43 }
 0x14c   : > { %v221_v46 = vmul.f32 %v219_v45, %v610_v0 }
 0x14e   : > { %222 = vst [vmem:[%s143_s7] sm:$0xff] %v221_v46 }
 0x14f   : > { %451 = shalt.err (!%p448_p4)
}
 0x150   : > { %331 = dma.vmem_to_hbm [thread:$0]  (%p564_p11), %s238_s8, 128, %s240_s9, %s224_s10  }
 0x151 PF: > { %s251_s22 = sand.u32 1, %s480_s13   ;;  %p657_p7 = scmp.ge.s32.totalorder %s492_s16, 2 }
 0x152   : > { %s252_s27 = scalar_lea.sflag [#allocation6], %s251_s22 }
 0x153   : > { %p338_p5 = pnand %p657_p7, %p568_p12 }
 0x155   : > { %p339_p8 = pneg %p338_p5 }
 0x157   : > { %475 = dma.done.wait (%p339_p8), %s252_s27, 128  }
 0x158   : > { %477 = vsyncadd (%p339_p8), %s252_s27, 4294967168  ;;  %p23_p10 = scmp.ge.s32.totalorder %s539_s18, 4   ;;  %s658_s13 = smov %s484_s14 }
 0x159   : > { %s659_s14 = smov %s488_s15  ;;  %s660_s15 = smov %s551_s21 }
 0x15a   : > { %s661_s16 = smov %s539_s18  ;;  %25 = sbr.rel (!%p23_p10) target bundleno = 11 (0xb), region = 69 }
 0x15f   :  { %258 = vsyncpa [#allocation5], 1 }
 0x160   :  { %260 = vsyncpa [#allocation5 + $0x1], 1 }
 0x161   :  { %261 = vsyncpa [#allocation6], 1 }
 0x162   :  { %263 = vsyncpa [#allocation6 + $0x1], 1 }

</bundles_post_ra>
